<compile_context>
chip_gen: v7x
topology: tpu7x:2x2x1
jax: 0.10.0
libtpu: 0.0.40
codegen_flags: <defaults>
</compile_context>

<pallas_src>
import jax
import jax.numpy as jnp
from jax import lax
from jax.experimental import pallas as pl
from jax.experimental.pallas import tpu as pltpu

# ---------------------------------------------------------------------------- constants
S1, P1, C1 = 28, 28 * 28, 32        # conv1: spatial side / #pixels / out channels
S2, P2, C2 = 14, 14 * 14, 64        # conv2 (after pool1)
S3, P3 = 7, 7 * 7                   # after pool2
P1R = 896                           # 28*28 padded up to a multiple of 128 lanes
P2R = 256                           # 14*14 padded up to a multiple of 128 lanes
HID, NCLS = 128, 10
TB = 8                              # images per grid step (batch tile)

# ---------------------------------------------------------------------------- roll helper
# pltpu.roll is documented to follow jnp.roll semantics (out[i] = in[(i - shift) % N]);
# detect the convention once with a tiny probe kernel so the gather direction is robust.
_ROLL_GATHER_SIGN = None


def _roll_probe_kernel(x_ref, o_ref):
    o_ref[...] = pltpu.roll(x_ref[...], shift=1, axis=1)


def _detect_roll_gather_sign():
    global _ROLL_GATHER_SIGN
    if _ROLL_GATHER_SIGN is not None:
        return _ROLL_GATHER_SIGN
    x = jnp.broadcast_to(jnp.arange(128, dtype=jnp.float32)[None, :], (8, 128))
    y = pl.pallas_call(_roll_probe_kernel,
                       out_shape=jax.ShapeDtypeStruct((8, 128), jnp.float32))(x)
    v = float(y[0, 0])
    _ROLL_GATHER_SIGN = 1 if v == 1.0 else -1   # -1 == jnp.roll convention (expected)
    return _ROLL_GATHER_SIGN


def _roll_gather(v, k, n):
    """Lane roll such that out[..., i] = v[..., (i + k) % n] (k is a static int)."""
    return pltpu.roll(v, shift=(_ROLL_GATHER_SIGN * k) % n, axis=1)


# ---------------------------------------------------------------------------- kernels
def conv_stack_kernel(x_ref, w1_ref, b1_ref, m1_ref, s1_ref,
                      w2_ref, b2_ref, m2_ref, s2_ref,
                      fm1_ref, fm2_ref, p2_ref, slab_ref):
    """Fused conv1+ReLU -> pool -> conv2+ReLU -> pool for TB images (channel-major).

    x_ref   : (TB, 1, 896)   zero-padded flattened 28x28 inputs
    w1_ref  : (9, 32, 1)     conv1 weights [tap, cout, 1]              (f32)
    b1_ref  : (32, 1)        conv1 bias                                (f32)
    m1_ref  : (9, 896)       conv1 tap validity masks                  (f32)
    s1_ref  : (896, 256)     pool1 stride-2 0/1 selection matrix       (bf16)
    w2_ref  : (64, 288)      conv2 weights [cout, tap*32 + cin]        (bf16)
    b2_ref  : (64, 1)        conv2 bias                                (f32)
    m2_ref  : (9, 256)       conv2 tap validity masks                  (f32)
    s2_ref  : (256, 49)      pool2 stride-2 0/1 selection matrix       (bf16)
    fm1_ref : (TB, 32, 784)  ReLU feature map 1 (NCHW, flattened HW)
    fm2_ref : (TB, 64, 196)  ReLU feature map 2 (NCHW, flattened HW)
    p2_ref  : (TB, 64, 49)   pooled activations feeding the FC stack
    slab_ref: (288, 256)     bf16 tap-major im2col scratch for conv2
    """
    f32, bf16 = jnp.float32, jnp.bfloat16

    for b in range(x_ref.shape[0]):
        xrow = x_ref[b]                                               # (1, 896)

        # ---- conv1 (Cin=1): 9 channel-major broadcast FMAs on the VPU (exact f32) ----
        acc1 = jnp.zeros((C1, P1R), f32)
        for t in range(9):
            dy, dx = t // 3 - 1, t % 3 - 1
            off = dy * S1 + dx
            if off == 0:
                xm = xrow                                             # center tap: no shift/mask
            else:
                xm = _roll_gather(xrow, off, P1R) * m1_ref[pl.ds(t, 1), :]
            acc1 = acc1 + w1_ref[t] * xm                              # (32,1)*(1,896) FMA
        y1 = jnp.maximum(acc1 + b1_ref[...], 0.0)                     # (32, 896)
        fm1_ref[b] = y1[:, :P1]                                       # lane-dense NCHW store

        # ---- 2x2 maxpool: lane-roll pairwise maxes + 0/1 selection matmul on the MXU ----
        a1 = jnp.maximum(y1, _roll_gather(y1, 1, P1R))                # max with (w+1)
        a1 = jnp.maximum(a1, _roll_gather(a1, S1, P1R))               # ... and the (h+1) pair
        p1 = jnp.dot(a1.astype(bf16), s1_ref[...],
                     preferred_element_type=f32)                      # (32, 256), lanes>=196 are 0

        # ---- conv2: build tap-major (288, 256) bf16 slab, single K=288 MXU matmul ----
        for t in range(9):
            dy, dx = t // 3 - 1, t % 3 - 1
            off = dy * S2 + dx
            if off == 0:
                sh = p1
            else:
                sh = _roll_gather(p1, off, P2R) * m2_ref[pl.ds(t, 1), :]
            slab_ref[pl.ds(t * C1, C1), :] = sh.astype(bf16)
        y2 = jnp.dot(w2_ref[...], slab_ref[...], preferred_element_type=f32)   # (64, 256)
        y2 = jnp.maximum(y2 + b2_ref[...], 0.0)
        fm2_ref[b] = y2[:, :P2]                                       # lane-dense NCHW store

        # ---- 2x2 maxpool -> pooled activations for the FC stack (PyTorch flatten order) ----
        a2 = jnp.maximum(y2, _roll_gather(y2, 1, P2R))
        a2 = jnp.maximum(a2, _roll_gather(a2, S2, P2R))
        p2_ref[b] = jnp.dot(a2.astype(bf16), s2_ref[...], preferred_element_type=f32)


def mlp_kernel(x_ref, w1_ref, b1_ref, w2_ref, b2_ref, o_ref):
    """Batch-tiled fc1 + ReLU + (dropout = identity in eval) + fc2; hidden stays in VMEM."""
    h = jnp.dot(x_ref[...].astype(jnp.bfloat16), w1_ref[...],
                preferred_element_type=jnp.float32)
    h = jnp.maximum(h + b1_ref[...], 0.0)
    # TODO(synk): nn.Dropout(p=0.5) is identity in eval/inference mode; training-mode RNG mask not implemented.
    o_ref[...] = (jnp.dot(h.astype(jnp.bfloat16), w2_ref[...],
                          preferred_element_type=jnp.float32) + b2_ref[...])


# ---------------------------------------------------------------------------- constant tables
def _tap_masks(side, padded):
    """(9, padded) f32: mask[t, p] = 1 if output pixel p has an in-bounds input for conv
    tap t under 'same' padding; pad lanes (p >= side*side) are always 0."""
    p = jnp.arange(padded)
    h, w = p // side, p % side
    inside = p < side * side
    rows = []
    for dy in (-1, 0, 1):
        for dx in (-1, 0, 1):
            ok = inside & (h + dy >= 0) & (h + dy < side) & (w + dx >= 0) & (w + dx < side)
            rows.append(ok.astype(jnp.float32))
    return jnp.stack(rows)


def _pool_select(side, padded_in, padded_out):
    """(padded_in, padded_out) bf16 0/1 matrix whose column q picks lane (2*(q//s))*side + 2*(q%s)
    (top-left corner of 2x2 window q); columns beyond (side//2)**2 select nothing."""
    s = side // 2
    q = jnp.arange(padded_out)
    sel = jnp.where(q < s * s, (2 * (q // s)) * side + 2 * (q % s), -1)
    p = jnp.arange(padded_in)
    return (p[:, None] == sel[None, :]).astype(jnp.bfloat16)


def prepare_params(params):
    """One-time weight re-layout / casting and constant-table construction."""
    _detect_roll_gather_sign()
    w1 = params["conv1_w"].reshape(C1, 9).T.reshape(9, C1, 1).astype(jnp.float32)
    b1 = params["conv1_b"].reshape(C1, 1).astype(jnp.float32)
    w2 = jnp.transpose(params["conv2_w"], (0, 2, 3, 1)).reshape(C2, 9 * C1).astype(jnp.bfloat16)
    b2 = params["conv2_b"].reshape(C2, 1).astype(jnp.float32)
    # p2 is emitted channel-major (c, h, w) == PyTorch's NCHW flatten order -> fc1 weight
    # only needs a transpose (no permutation).
    fc1_w = params["fc1_w"].T.astype(jnp.bfloat16)          # (3136, 128)
    fc1_b = params["fc1_b"].reshape(1, HID).astype(jnp.float32)
    fc2_w = params["fc2_w"].T.astype(jnp.bfloat16)          # (128, 10)
    fc2_b = params["fc2_b"].reshape(1, NCLS).astype(jnp.float32)
    return dict(w1=w1, b1=b1, m1=_tap_masks(S1, P1R), s1=_pool_select(S1, P1R, P2R),
                w2=w2, b2=b2, m2=_tap_masks(S2, P2R), s2=_pool_select(S2, P2R, P3),
                fc1_w=fc1_w, fc1_b=fc1_b, fc2_w=fc2_w, fc2_b=fc2_b)


# ---------------------------------------------------------------------------- forward
def cnn_forward_pallas(x_nchw, prepped):
    _detect_roll_gather_sign()
    return _cnn_forward_jit(x_nchw, prepped)


@jax.jit
def _cnn_forward_jit(x_nchw, prepped):
    """CNNModel.forward (task_type='classification', eval mode).
    Returns (logits, [feature_map_1, feature_map_2]) with feature maps in NCHW."""
    n = x_nchw.shape[0]
    n_pad = ((n + TB - 1) // TB) * TB
    grid = (n_pad // TB,)

    # flatten spatially and zero-pad: batch -> multiple of TB, lanes 784 -> 896.
    x = jnp.zeros((n_pad, 1, P1R), jnp.float32)
    x = x.at[:n, :, :P1].set(x_nchw.reshape(n, 1, P1).astype(jnp.float32))

    fm1, fm2, p2 = pl.pallas_call(
        conv_stack_kernel,
        out_shape=(jax.ShapeDtypeStruct((n_pad, C1, P1), jnp.float32),
                   jax.ShapeDtypeStruct((n_pad, C2, P2), jnp.float32),
                   jax.ShapeDtypeStruct((n_pad, C2, P3), jnp.float32)),
        grid_spec=pltpu.PrefetchScalarGridSpec(
            num_scalar_prefetch=0,
            grid=grid,
            in_specs=[
                pl.BlockSpec((TB, 1, P1R), lambda i: (i, 0, 0)),        # x
                pl.BlockSpec((9, C1, 1), lambda i: (0, 0, 0)),          # w1
                pl.BlockSpec((C1, 1), lambda i: (0, 0)),                # b1
                pl.BlockSpec((9, P1R), lambda i: (0, 0)),               # m1
                pl.BlockSpec((P1R, P2R), lambda i: (0, 0)),             # s1
                pl.BlockSpec((C2, 9 * C1), lambda i: (0, 0)),           # w2
                pl.BlockSpec((C2, 1), lambda i: (0, 0)),                # b2
                pl.BlockSpec((9, P2R), lambda i: (0, 0)),               # m2
                pl.BlockSpec((P2R, P3), lambda i: (0, 0)),              # s2
            ],
            out_specs=[
                pl.BlockSpec((TB, C1, P1), lambda i: (i, 0, 0)),
                pl.BlockSpec((TB, C2, P2), lambda i: (i, 0, 0)),
                pl.BlockSpec((TB, C2, P3), lambda i: (i, 0, 0)),
            ],
            scratch_shapes=[pltpu.VMEM((9 * C1, P2R), jnp.bfloat16)],
        ),
        compiler_params=pltpu.CompilerParams(dimension_semantics=("parallel",)),
    )(x, prepped["w1"], prepped["b1"], prepped["m1"], prepped["s1"],
      prepped["w2"], prepped["b2"], prepped["m2"], prepped["s2"])

    logits = pl.pallas_call(
        mlp_kernel,
        out_shape=jax.ShapeDtypeStruct((n_pad, NCLS), jnp.float32),
        grid_spec=pltpu.PrefetchScalarGridSpec(
            num_scalar_prefetch=0,
            grid=grid,
            in_specs=[
                pl.BlockSpec((TB, C2 * P3), lambda i: (i, 0)),
                pl.BlockSpec((C2 * P3, HID), lambda i: (0, 0)),
                pl.BlockSpec((1, HID), lambda i: (0, 0)),
                pl.BlockSpec((HID, NCLS), lambda i: (0, 0)),
                pl.BlockSpec((1, NCLS), lambda i: (0, 0)),
            ],
            out_specs=pl.BlockSpec((TB, NCLS), lambda i: (i, 0)),
        ),
        compiler_params=pltpu.CompilerParams(dimension_semantics=("parallel",)),
    )(p2.reshape(n_pad, C2 * P3), prepped["fc1_w"], prepped["fc1_b"],
      prepped["fc2_w"], prepped["fc2_b"])

    fmap1 = fm1[:n].reshape(n, C1, S1, S1)       # already NCHW -> reshape only, no transpose
    fmap2 = fm2[:n].reshape(n, C2, S2, S2)
    return logits[:n], [fmap1, fmap2]


# ---------------------------------------------------------------------------- reference (pure JAX)
def cnn_forward_reference(x_nchw, params):
    x = x_nchw
    fms = []
    for w, b in ((params["conv1_w"], params["conv1_b"]),
                 (params["conv2_w"], params["conv2_b"])):
        y = lax.conv_general_dilated(x, w, (1, 1), ((1, 1), (1, 1)),
                                     dimension_numbers=("NCHW", "OIHW", "NCHW"))
        y = jax.nn.relu(y + b[None, :, None, None])
        fms.append(y)
        x = lax.reduce_window(y, -jnp.inf, lax.max, (1, 1, 2, 2), (1, 1, 2, 2), "VALID")
    flat = x.reshape(x.shape[0], -1)
    hidden = jax.nn.relu(flat @ params["fc1_w"].T + params["fc1_b"])
    logits = hidden @ params["fc2_w"].T + params["fc2_b"]
    return logits, fms


# ---------------------------------------------------------------------------- main
def make_params(key):
    ks = jax.random.split(key, 8)
    return {
        "conv1_w": 0.10 * jax.random.normal(ks[0], (C1, 1, 3, 3), jnp.float32),
        "conv1_b": 0.01 * jax.random.normal(ks[1], (C1,), jnp.float32),
        "conv2_w": 0.05 * jax.random.normal(ks[2], (C2, C1, 3, 3), jnp.float32),
        "conv2_b": 0.01 * jax.random.normal(ks[3], (C2,), jnp.float32),
        "fc1_w": 0.02 * jax.random.normal(ks[4], (HID, C2 * P3), jnp.float32),
        "fc1_b": 0.01 * jax.random.normal(ks[5], (HID,), jnp.float32),
        "fc2_w": 0.05 * jax.random.normal(ks[6], (NCLS, HID), jnp.float32),
        "fc2_b": 0.01 * jax.random.normal(ks[7], (NCLS,), jnp.float32),
    }


if __name__ == "__main__":
    key = jax.random.PRNGKey(0)
    pkey, xkey = jax.random.split(key)
    params = make_params(pkey)
    prepped = prepare_params(params)

    # Input must be (N, 1, 28, 28): the module's fc1 size (3136) derives from a 28x28 dummy.
    x = jax.random.normal(xkey, (16, 1, 28, 28), jnp.float32)

    logits, fmaps = cnn_forward_pallas(x, prepped)
    logits = jax.block_until_ready(logits)
    fmaps = [jax.block_until_ready(f) for f in fmaps]

    ref_logits, ref_fmaps = cnn_forward_reference(x, params)
    assert logits.shape == (16, NCLS)
    assert fmaps[0].shape == (16, C1, S1, S1) and fmaps[1].shape == (16, C2, S2, S2)
    assert jnp.allclose(logits, ref_logits, rtol=5e-2, atol=5e-2), "logits mismatch"
    assert jnp.allclose(fmaps[0], ref_fmaps[0], rtol=5e-2, atol=5e-2), "feature map 1 mismatch"
    assert jnp.allclose(fmaps[1], ref_fmaps[1], rtol=5e-2, atol=5e-2), "feature map 2 mismatch"

    print("KERNEL_OK")
</pallas_src>

<mosaic_0001>
module attributes {stable_mosaic.version = 11 : i64} {
  func.func @_roll_probe_kernel(%arg0: memref<8x128xf32, #tpu.memory_space<vmem>>, %arg1: memref<8x128xf32, #tpu.memory_space<vmem>>) attributes {dimension_semantics = [], scalar_prefetch = 0 : i64, scratch_operands = 0 : i64, tpu.core_type = #tpu.core_type<tc>} {
    %c0 = arith.constant 0 : index
    %c0_0 = arith.constant 0 : index
    %0 = vector.load %arg0[%c0, %c0_0] : memref<8x128xf32, #tpu.memory_space<vmem>>, vector<8x128xf32>
    %c1_i32 = arith.constant 1 : i32
    %1 = tpu.dynamic_rotate %0 by %c1_i32 dim 1 : vector<8x128xf32>, i32 -> vector<8x128xf32>
    %c0_1 = arith.constant 0 : index
    %c0_2 = arith.constant 0 : index
    %2 = vector.load %arg1[%c0_1, %c0_2] : memref<8x128xf32, #tpu.memory_space<vmem>>, vector<8x128xf32>
    tpu.vector_store %arg1[%c0_1, %c0_2], %1 {strides = array<i32>} : memref<8x128xf32, #tpu.memory_space<vmem>>, vector<8x128xf32>,
    return
  }
}

</mosaic_0001>

<bundles_post_ra>
// kernel: tpu_custom_call.1
= control target key start
LH: loop header
LB: loop body
LE: loop exit
PB: predicated region body
PF: predicated region fallthrough
CT: control target
= control target key end

     0   :  { %6 = vsyncpa [#allocation3], 0  ;;  %s128_s0 = inlined_call_operand.hbm [shape: f32[8,128], index: 0, kind: input, shape index: {}]   ;;  %s129_s1 = inlined_call_operand.hbm [shape: f32[8,128], index: 1, kind: output, shape index: {}]  }
   0x1   :  { %7 = vsyncpa [#allocation4], 0  ;;  %s91_s6 = smov [#allocation2]   ;;  %s43_s10 = scalar_lea.hbm %s128_s0, 128 }
   0x2   :  { %s14_s7 = sshll.u32 %s91_s6, 4  ;;  %p44_p0 = scmp.ne.s32.totalorder %s128_s0, %s43_s10  ;;  %s15_s7 = int_to_ptr.vmem [resolvable:$true] %s14_s7 }
   0x3   :  { %p47_p1 = scmp.lt.u32.totalorder %s43_s10, %s128_s0 }
   0x5   :  { %p49_p2 = pnand %p47_p1, %p44_p0 }
   0x7   :  { %52 = shalt.err (!%p49_p2)
}
   0x8   :  { %s53_s15 = scalar_lea.vmem %s15_s7, 128  ;;  %p58_p4 = scmp.lt.s32.totalorder %s15_s7, %s15_s7 }
   0x9   :  { %p54_p3 = scmp.ne.s32.totalorder %s15_s7, %s53_s15  ;;  %p59_p5 = scmp.lt.s32.totalorder %s53_s15, %s53_s15 }
   0xb   :  { %p60_p6 = por %p59_p5, %p58_p4 }
   0xd   :  { %p61_p7 = pnand %p60_p6, %p54_p3 }
   0xf   :  { %64 = shalt.err (!%p61_p7)
}
  0x10   :  { %17 = dma.hbm_to_vmem [thread:$0]  %s128_s0, 128, %s15_s7, [#allocation3]  }
  0x11   :  { %87 = dma.done.wait [#allocation3], 128  }
  0x12   :  { %88 = vsyncadd [#allocation3], 4294967168  ;;  %v21_v0 = vld [vmem:[#allocation2] sm:$0xff]  ;;  %s92_s18 = smov 1   ;;  %s93_s19 = smov [#allocation5]  }
  0x13   :  { %22 = vrot.lane.b32.xlu0 %v21_v0, %s92_s18  ;;  %s31_s20 = sshll.u32 %s93_s19, 4  ;;  %s32_s20 = int_to_ptr.vmem [resolvable:$true] %s31_s20 }
  0x14   :  { %s65_s21 = scalar_lea.vmem %s32_s20, 128  ;;  %p70_p9 = scmp.lt.s32.totalorder %s32_s20, %s32_s20 }
  0x15   :  { %p66_p8 = scmp.ne.s32.totalorder %s32_s20, %s65_s21  ;;  %p71_p10 = scmp.lt.s32.totalorder %s65_s21, %s65_s21 }
  0x17   :  { %p72_p11 = por %p71_p10, %p70_p9 }
  0x19   :  { %p73_p12 = pnand %p72_p11, %p66_p8 }
  0x85   :  { %v23_v1 = vpop.permute.xlu0 %22 }
  0x86   :  { %24 = vst [vmem:[#allocation5] sm:$0xff] %v23_v1 }
  0x87   :  { %76 = shalt.err (!%p73_p12)
}
  0x88   :  { %s77_s0 = scalar_lea.hbm %s129_s1, 128 }
  0x89   :  { %p78_p13 = scmp.ne.s32.totalorder %s129_s1, %s77_s0  ;;  %p81_p0 = scmp.lt.u32.totalorder %s77_s0, %s129_s1 }
  0x8b   :  { %p83_p1 = pnand %p81_p0, %p78_p13 }
  0x8d   :  { %86 = shalt.err (!%p83_p1)
}
  0x8e   :  { %34 = dma.vmem_to_hbm [thread:$0]  %s32_s20, 128, %s129_s1, [#allocation4]  }
  0x8f   :  { %89 = dma.done.wait [#allocation4], 128  }
  0x90   :  { %90 = vsyncadd [#allocation4], 4294967168 }
  0x91   :  { %38 = vsyncpa [#allocation3], 1 }
  0x92   :  { %39 = vsyncpa [#allocation4], 1 }

</bundles_post_ra>
